<compile_context>
chip_gen: v5e
topology: v5e:2x2
jax: 0.10.0
libtpu: 0.0.40
codegen_flags: <defaults>
</compile_context>

<pallas_src>
import math

import jax
import jax.numpy as jnp
import numpy as np
from jax.experimental import pallas as pl
from jax.experimental.pallas import tpu as pltpu


_TARGET_TILE_BYTES = 4 << 20   # ~4 MiB per buffer (2-4 MiB is the roofline sweet spot)
_MAX_LANES = 2048              # lane-width cap for the 2-D slab (multiple of 128)
_FALLBACK_LANES = 512          # lane width when n has no 128-multiple divisor


def h_swish_kernel(x_ref, o_ref):
    x = x_ref[...]
    # h_swish(x) = x * relu6(x + 3) / 6
    o_ref[...] = x * (jnp.clip(x + 3.0, 0.0, 6.0) / 6.0)


def _round_up(a, m):
    return (a + m - 1) // m * m


def h_swish(x):
    """Applies h_swish elementwise to an array of any shape (e.g. NCHW)."""
    orig_shape = x.shape
    dtype = x.dtype
    itemsize = jnp.dtype(dtype).itemsize
    # Native sublane packing: 8 rows/vreg for 4-byte dtypes, 16 for 2-byte, 32 for 1-byte.
    sub = max(8, 32 // itemsize)

    n = math.prod(orig_shape) if orig_shape else 1
    if n == 0:
        return x

    # ---- choose a lane-dense 2-D slab (rows, lanes), preferring a no-pad layout ----
    lanes = 0
    if n % 128 == 0:
        m = n // 128
        for g in range(min(_MAX_LANES // 128, m), 0, -1):
            if m % g == 0:
                lanes = 128 * g
                break
    if lanes:
        rows = n // lanes
        x2d = x.reshape(rows, lanes)          # pure reshape, no extra HBM traffic
        padded = False
    else:
        # Rare fallback: element count not a multiple of 128 -> pad the tail.
        lanes = _FALLBACK_LANES
        rows = _round_up(pl.cdiv(n, lanes), sub)
        x2d = jnp.pad(x.reshape(-1), (0, rows * lanes - n)).reshape(rows, lanes)
        padded = True

    # ---- tile selection ----
    tm_cap = max(sub, (_TARGET_TILE_BYTES // (lanes * itemsize)) // sub * sub)
    if rows <= tm_cap:
        # Whole slab fits one tile: block == full array, single grid step
        # (no pointless split on single-TensorCore v5e/v6e).
        tm = rows
    else:
        # >= 4 grid steps so a v7x megacore gets >= 2 pipelined steps per core,
        # while never exceeding the ~4 MiB/buffer cap.
        tm = min(tm_cap, _round_up(pl.cdiv(rows, 4), sub))
    grid = pl.cdiv(rows, tm)                  # boundary block handles the ragged tail

    out2d = pl.pallas_call(
        h_swish_kernel,
        out_shape=jax.ShapeDtypeStruct((rows, lanes), dtype),
        grid=(grid,),
        in_specs=[pl.BlockSpec((tm, lanes), lambda i: (i, 0))],
        out_specs=pl.BlockSpec((tm, lanes), lambda i: (i, 0)),
        compiler_params=pltpu.CompilerParams(
            dimension_semantics=("parallel",),
            vmem_limit_bytes=32 << 20,
        ),
    )(x2d)

    if padded:
        return out2d.reshape(-1)[:n].reshape(orig_shape)
    return out2d.reshape(orig_shape)


def h_swish_reference(x):
    """Pure-JAX reference matching the PyTorch module exactly."""
    return x * (jnp.clip(x + 3.0, 0.0, 6.0) / 6.0)


if __name__ == "__main__":
    key = jax.random.PRNGKey(0)
    B, C, H, W = 2, 4, 16, 16
    # Scale inputs so both relu6 clamp boundaries (-3 and +3) are exercised.
    x = jax.random.normal(key, (B, C, H, W), dtype=jnp.float32) * 4.0

    y = jax.block_until_ready(h_swish(x))
    ref = h_swish_reference(x)
    np.testing.assert_allclose(np.asarray(y), np.asarray(ref), rtol=1e-6, atol=1e-6)
    assert y.shape == x.shape and y.dtype == x.dtype

    # Also exercise the padded / boundary-block fallback path with an odd size.
    x2 = jax.random.normal(jax.random.PRNGKey(1), (3, 5, 7), dtype=jnp.float32) * 4.0
    y2 = jax.block_until_ready(h_swish(x2))
    np.testing.assert_allclose(np.asarray(y2), np.asarray(h_swish_reference(x2)),
                               rtol=1e-6, atol=1e-6)
    assert y2.shape == x2.shape and y2.dtype == x2.dtype

    print("KERNEL_OK")
</pallas_src>

<mosaic_0001>
module attributes {stable_mosaic.version = 11 : i64} {
  func.func @h_swish_kernel(%arg0: i32, %arg1: memref<1x2048xf32, #tpu.memory_space<vmem>>, %arg2: memref<1x2048xf32, #tpu.memory_space<vmem>>) attributes {dimension_semantics = [#tpu.dimension_semantics<parallel>], iteration_bounds = array<i64: 1>, scalar_prefetch = 0 : i64, scratch_operands = 0 : i64, tpu.core_type = #tpu.core_type<tc>, window_params = [{transform_indices = @transform_0, window_bounds = array<i64: 1, 2048>}, {transform_indices = @transform_1, window_bounds = array<i64: 1, 2048>}]} {
    %c0 = arith.constant 0 : index
    %c0_0 = arith.constant 0 : index
    %0 = vector.load %arg1[%c0, %c0_0] : memref<1x2048xf32, #tpu.memory_space<vmem>>, vector<1x2048xf32>
    %cst = arith.constant 3.000000e+00 : f32
    %1 = vector.broadcast %cst : f32 to vector<1x2048xf32>
    %2 = arith.addf %0, %1 : vector<1x2048xf32>
    %cst_1 = arith.constant 0.000000e+00 : f32
    %cst_2 = arith.constant 6.000000e+00 : f32
    %3 = vector.broadcast %cst_1 : f32 to vector<1x2048xf32>
    %4 = arith.maximumf %3, %2 : vector<1x2048xf32>
    %5 = vector.broadcast %cst_2 : f32 to vector<1x2048xf32>
    %6 = arith.minimumf %5, %4 : vector<1x2048xf32>
    %cst_3 = arith.constant 6.000000e+00 : f32
    %7 = vector.broadcast %cst_3 : f32 to vector<1x2048xf32>
    %8 = arith.divf %6, %7 : vector<1x2048xf32>
    %9 = arith.mulf %0, %8 : vector<1x2048xf32>
    %c0_4 = arith.constant 0 : index
    %c0_5 = arith.constant 0 : index
    %10 = vector.load %arg2[%c0_4, %c0_5] : memref<1x2048xf32, #tpu.memory_space<vmem>>, vector<1x2048xf32>
    tpu.vector_store %arg2[%c0_4, %c0_5], %9 {strides = array<i32>} : memref<1x2048xf32, #tpu.memory_space<vmem>>, vector<1x2048xf32>,
    return
  }
  func.func @transform_0(%arg0: i32) -> (i32, i32) {
    %c0_i32 = arith.constant 0 : i32
    %c0_i32_0 = arith.constant 0 : i32
    return %arg0, %c0_i32 : i32, i32
  }
  func.func @transform_1(%arg0: i32) -> (i32, i32) {
    %c0_i32 = arith.constant 0 : i32
    %c0_i32_0 = arith.constant 0 : i32
    return %arg0, %c0_i32 : i32, i32
  }
}

</mosaic_0001>

<bundles_post_ra>
// kernel: tpu_custom_call.1
= control target key start
LH: loop header
LB: loop body
LE: loop exit
PB: predicated region body
PF: predicated region fallthrough
CT: control target
= control target key end

     0   :  { %6 = vsyncpa [#allocation3], 0  ;;  %s137_s0 = inlined_call_operand.hbm [shape: f32[1,2048], index: 0, kind: input, shape index: {}]   ;;  %s138_s1 = inlined_call_operand.hbm [shape: f32[1,2048], index: 1, kind: output, shape index: {}]  }
   0x1   :  { %7 = vsyncpa [#allocation4], 0  ;;  %s13_s8 = sshll.u32 %s137_s0, 4  ;;  %s118_s9 = smov [#allocation2]   ;;  %s14_s8 = int_to_ptr.hbm [resolvable:$true] %s13_s8 }
   0x2   :  { %s15_s10 = sshll.u32 %s118_s9, 4  ;;  %s16_s10 = int_to_ptr.vmem [resolvable:$true] %s15_s10 }
   0x3   :  { %18 = dma.hbm_to_vmem [thread:$0]  %s14_s8, 256, %s16_s10, [#allocation3]  }
   0x4   :  { %114 = dma.done.wait [#allocation3], 256  }
   0x5   :  { %115 = vsyncadd [#allocation3], 4294967040  ;;  %v119_v0 = vmov 6.0   ;;  %v23_v2 = vld [vmem:[#allocation2] sm:$0xff]  ;;  %v24_v3 = vld [vmem:[#allocation2 + $0x8] sm:$0xff]  ;;  %s120_s0 = smov [#allocation5]  }
   0x6   :  { %64 = vrcp.f32 %v119_v0  ;;  %v25_v4 = vadd.f32 3.0, %v23_v2  ;;  %v26_v6 = vadd.f32 3.0, %v24_v3  ;;  %s49_s11 = sshll.u32 %s120_s0, 4  ;;  %s51_s14 = sshll.u32 %s138_s1, 4  ;;  %s50_s11 = int_to_ptr.vmem [resolvable:$true] %s49_s11  ;;  %s52_s14 = int_to_ptr.hbm [resolvable:$true] %s51_s14 }
   0x8   :  { %v27_v7 = vmax.f32 %v25_v4, 0.0  ;;  %v28_v9 = vmax.f32 %v26_v6, 0.0 }
   0xa   :  { %v29_v11 = vmin.f32 %v27_v7, 6.0  ;;  %v30_v12 = vmin.f32 %v28_v9, 6.0 }
   0xc   :  { %v65_v1 = vpop.eup %64 }
   0xd   :  { %v32_v5 = vmul.f32 6.0, %v65_v1  ;;  %vm36_vm0 = vweird.f32 %v65_v1 }
   0xf   :  { %v33_v8 = vsub.f32 1.0, %v32_v5 }
  0x11   :  { %v34_v10 = vmul.f32 %v65_v1, %v33_v8 }
  0x13   :  { %v35_v13 = vadd.f32 %v65_v1, %v34_v10 }
  0x15   :  { %v37_v14 = vsel %vm36_vm0, %v65_v1, %v35_v13 }
  0x16   :  { %v38_v15 = vmul.f32 %v37_v14, %v29_v11  ;;  %v39_v16 = vmul.f32 %v37_v14, %v30_v12 }
  0x18   :  { %v40_v17 = vmul.f32 %v38_v15, %v23_v2  ;;  %v41_v18 = vmul.f32 %v39_v16, %v24_v3 }
  0x1a   :  { %42 = vst [vmem:[#allocation5] sm:$0xff] %v40_v17 }
  0x1b   :  { %43 = vst [vmem:[#allocation5 + $0x8] sm:$0xff] %v41_v18 }
  0x1c   :  { %54 = dma.vmem_to_hbm [thread:$0]  %s50_s11, 256, %s52_s14, [#allocation4]  }
  0x1d   :  { %116 = dma.done.wait [#allocation4], 256  }
  0x1e   :  { %117 = vsyncadd [#allocation4], 4294967040 }
  0x1f   :  { %59 = vsyncpa [#allocation3], 1 }
  0x20   :  { %60 = vsyncpa [#allocation4], 1 }

</bundles_post_ra>
